<compile_context>
chip_gen: v7x
topology: tpu7x:2x2x1
jax: 0.10.0
libtpu: 0.0.40
codegen_flags: <defaults>
</compile_context>

<pallas_src>
import jax
import jax.numpy as jnp
from jax.experimental import pallas as pl
from jax.experimental.pallas import tpu as pltpu

IN_FEATURES = 10
OUT_FEATURES = 1


def linear_kernel(params_ref, xT_ref, o_ref):
    # params_ref: (IN+1,) f32 in SMEM  (10 weights followed by the bias)
    # xT_ref:     (IN, TB) f32 in VMEM (batch on lanes)
    # o_ref:      (1, TB)  f32 in VMEM (lane-dense output block)
    acc = xT_ref[0:1, :] * params_ref[0]
    for f in range(1, IN_FEATURES):                  # unrolled VPU accumulate
        acc = acc + xT_ref[f:f + 1, :] * params_ref[f]
    o_ref[...] = (acc + params_ref[IN_FEATURES]).astype(o_ref.dtype)


def _pick_tb(B):
    """Lane tile for the batch axis."""
    if B <= 256:
        # Single step; block extent equals the full array dim, so the 128-lane
        # divisibility rule does not apply.
        return B
    # Aim for ~2 grid steps (keeps both v7x TensorCores busy via the
    # 'parallel' axis) but cap the tile at 8192 lanes so very large batches
    # still run in a handful of well-pipelined steps.
    tb = 128 * pl.cdiv(pl.cdiv(B, 2), 128)
    return min(tb, 8192)


def simple_nn_forward(x, weight, bias, *, tb=None):
    """Forward pass of SimpleNN (Linear(10, 1)) as a Pallas TPU kernel.

    x:      (B, IN)   f32
    weight: (OUT, IN) f32 (PyTorch convention; OUT == 1)
    bias:   (OUT,)    f32
    returns (B, OUT)  f32
    """
    B, in_f = x.shape
    out_f, w_in = weight.shape
    assert out_f == OUT_FEATURES and in_f == IN_FEATURES and w_in == IN_FEATURES

    if tb is None:
        tb = _pick_tb(B)
    grid = (pl.cdiv(B, tb),)

    # Lane-dense layout plumbing (wrapper-side, fused by XLA):
    xT = x.T.astype(jnp.float32)                                  # (IN, B)
    params = jnp.concatenate(
        [weight.reshape(-1), bias.reshape(-1)]).astype(jnp.float32)  # (IN+1,)

    out_1B = pl.pallas_call(
        linear_kernel,
        out_shape=jax.ShapeDtypeStruct((OUT_FEATURES, B), jnp.float32),
        grid=grid,
        in_specs=[
            # weights + bias: tiny scalar vector in SMEM (no VMEM tile, no DMA
            # pipeline slot).
            pl.BlockSpec(memory_space=pltpu.MemorySpace.SMEM),
            # x^T: feature rows are full extent (10), batch tiled on lanes.
            pl.BlockSpec((in_f, tb), lambda i: (0, i)),
        ],
        # Lane-dense output block -> unmasked vector stores.
        out_specs=pl.BlockSpec((OUT_FEATURES, tb), lambda i: (0, i)),
        compiler_params=pltpu.CompilerParams(
            dimension_semantics=("parallel",),
        ),
    )(params, xT)

    # (1, B) -> (B, 1): free reshape (same contiguous data for OUT == 1).
    return out_1B.reshape(B, OUT_FEATURES)


if __name__ == "__main__":
    key = jax.random.PRNGKey(0)
    k_x, k_w, k_b, k_x2, k_x3 = jax.random.split(key, 5)

    # Parameters: mimic PyTorch's U(-1/sqrt(in), 1/sqrt(in)) init.
    bound = 1.0 / jnp.sqrt(jnp.float32(IN_FEATURES))
    weight = jax.random.uniform(
        k_w, (OUT_FEATURES, IN_FEATURES), jnp.float32, -bound, bound)
    bias = jax.random.uniform(
        k_b, (OUT_FEATURES,), jnp.float32, -bound, bound)

    # Small demo batch consistent with Linear(10, 1): x is [batch=8, 10].
    B = 8
    x = jax.random.normal(k_x, (B, IN_FEATURES), dtype=jnp.float32)
    out = simple_nn_forward(x, weight, bias)
    jax.block_until_ready(out)
    ref = x @ weight.T + bias
    assert out.shape == (B, OUT_FEATURES)
    assert jnp.allclose(out, ref, atol=1e-5, rtol=1e-5)

    # Large batch: tb=1024 -> 2 lane-tiled grid steps (megacore-friendly).
    B2 = 2048
    x2 = jax.random.normal(k_x2, (B2, IN_FEATURES), dtype=jnp.float32)
    out2 = simple_nn_forward(x2, weight, bias)
    jax.block_until_ready(out2)
    ref2 = x2 @ weight.T + bias
    assert out2.shape == (B2, OUT_FEATURES)
    assert jnp.allclose(out2, ref2, atol=1e-5, rtol=1e-5)

    # Ragged batch (not a multiple of the lane tile) exercises masked OOB
    # output writes on the final block.
    B3 = 1000
    x3 = jax.random.normal(k_x3, (B3, IN_FEATURES), dtype=jnp.float32)
    out3 = simple_nn_forward(x3, weight, bias)
    jax.block_until_ready(out3)
    ref3 = x3 @ weight.T + bias
    assert out3.shape == (B3, OUT_FEATURES)
    assert jnp.allclose(out3, ref3, atol=1e-5, rtol=1e-5)

    print("KERNEL_OK")
</pallas_src>

<mosaic_0001>
module attributes {stable_mosaic.version = 11 : i64} {
  func.func @linear_kernel(%arg0: i32, %arg1: memref<11xf32, #tpu.memory_space<smem>>, %arg2: memref<10x8xf32, #tpu.memory_space<vmem>>, %arg3: memref<1x8xf32, #tpu.memory_space<vmem>>) attributes {dimension_semantics = [#tpu.dimension_semantics<parallel>], iteration_bounds = array<i64: 1>, scalar_prefetch = 0 : i64, scratch_operands = 0 : i64, tpu.core_type = #tpu.core_type<tc>, window_params = [{transform_indices = @transform_0, window_bounds = array<i64: 11>}, {transform_indices = @transform_1, window_bounds = array<i64: 10, 8>}, {transform_indices = @transform_2, window_bounds = array<i64: 1, 8>}]} {
    %c0 = arith.constant 0 : index
    %c0_0 = arith.constant 0 : index
    %0 = vector.load %arg2[%c0, %c0_0] : memref<10x8xf32, #tpu.memory_space<vmem>>, vector<1x8xf32>
    %c0_1 = arith.constant 0 : index
    %1 = memref.load %arg1[%c0_1] : memref<11xf32, #tpu.memory_space<smem>>
    %2 = vector.broadcast %1 : f32 to vector<1x8xf32>
    %3 = arith.mulf %0, %2 : vector<1x8xf32>
    %c1 = arith.constant 1 : index
    %c0_2 = arith.constant 0 : index
    %4 = vector.load %arg2[%c1, %c0_2] : memref<10x8xf32, #tpu.memory_space<vmem>>, vector<1x8xf32>
    %c1_3 = arith.constant 1 : index
    %5 = memref.load %arg1[%c1_3] : memref<11xf32, #tpu.memory_space<smem>>
    %6 = vector.broadcast %5 : f32 to vector<1x8xf32>
    %7 = arith.mulf %4, %6 : vector<1x8xf32>
    %8 = arith.addf %3, %7 : vector<1x8xf32>
    %c2 = arith.constant 2 : index
    %c0_4 = arith.constant 0 : index
    %9 = vector.load %arg2[%c2, %c0_4] : memref<10x8xf32, #tpu.memory_space<vmem>>, vector<1x8xf32>
    %c2_5 = arith.constant 2 : index
    %10 = memref.load %arg1[%c2_5] : memref<11xf32, #tpu.memory_space<smem>>
    %11 = vector.broadcast %10 : f32 to vector<1x8xf32>
    %12 = arith.mulf %9, %11 : vector<1x8xf32>
    %13 = arith.addf %8, %12 : vector<1x8xf32>
    %c3 = arith.constant 3 : index
    %c0_6 = arith.constant 0 : index
    %14 = vector.load %arg2[%c3, %c0_6] : memref<10x8xf32, #tpu.memory_space<vmem>>, vector<1x8xf32>
    %c3_7 = arith.constant 3 : index
    %15 = memref.load %arg1[%c3_7] : memref<11xf32, #tpu.memory_space<smem>>
    %16 = vector.broadcast %15 : f32 to vector<1x8xf32>
    %17 = arith.mulf %14, %16 : vector<1x8xf32>
    %18 = arith.addf %13, %17 : vector<1x8xf32>
    %c4 = arith.constant 4 : index
    %c0_8 = arith.constant 0 : index
    %19 = vector.load %arg2[%c4, %c0_8] : memref<10x8xf32, #tpu.memory_space<vmem>>, vector<1x8xf32>
    %c4_9 = arith.constant 4 : index
    %20 = memref.load %arg1[%c4_9] : memref<11xf32, #tpu.memory_space<smem>>
    %21 = vector.broadcast %20 : f32 to vector<1x8xf32>
    %22 = arith.mulf %19, %21 : vector<1x8xf32>
    %23 = arith.addf %18, %22 : vector<1x8xf32>
    %c5 = arith.constant 5 : index
    %c0_10 = arith.constant 0 : index
    %24 = vector.load %arg2[%c5, %c0_10] : memref<10x8xf32, #tpu.memory_space<vmem>>, vector<1x8xf32>
    %c5_11 = arith.constant 5 : index
    %25 = memref.load %arg1[%c5_11] : memref<11xf32, #tpu.memory_space<smem>>
    %26 = vector.broadcast %25 : f32 to vector<1x8xf32>
    %27 = arith.mulf %24, %26 : vector<1x8xf32>
    %28 = arith.addf %23, %27 : vector<1x8xf32>
    %c6 = arith.constant 6 : index
    %c0_12 = arith.constant 0 : index
    %29 = vector.load %arg2[%c6, %c0_12] : memref<10x8xf32, #tpu.memory_space<vmem>>, vector<1x8xf32>
    %c6_13 = arith.constant 6 : index
    %30 = memref.load %arg1[%c6_13] : memref<11xf32, #tpu.memory_space<smem>>
    %31 = vector.broadcast %30 : f32 to vector<1x8xf32>
    %32 = arith.mulf %29, %31 : vector<1x8xf32>
    %33 = arith.addf %28, %32 : vector<1x8xf32>
    %c7 = arith.constant 7 : index
    %c0_14 = arith.constant 0 : index
    %34 = vector.load %arg2[%c7, %c0_14] : memref<10x8xf32, #tpu.memory_space<vmem>>, vector<1x8xf32>
    %c7_15 = arith.constant 7 : index
    %35 = memref.load %arg1[%c7_15] : memref<11xf32, #tpu.memory_space<smem>>
    %36 = vector.broadcast %35 : f32 to vector<1x8xf32>
    %37 = arith.mulf %34, %36 : vector<1x8xf32>
    %38 = arith.addf %33, %37 : vector<1x8xf32>
    %c8 = arith.constant 8 : index
    %c0_16 = arith.constant 0 : index
    %39 = vector.load %arg2[%c8, %c0_16] : memref<10x8xf32, #tpu.memory_space<vmem>>, vector<1x8xf32>
    %c8_17 = arith.constant 8 : index
    %40 = memref.load %arg1[%c8_17] : memref<11xf32, #tpu.memory_space<smem>>
    %41 = vector.broadcast %40 : f32 to vector<1x8xf32>
    %42 = arith.mulf %39, %41 : vector<1x8xf32>
    %43 = arith.addf %38, %42 : vector<1x8xf32>
    %c9 = arith.constant 9 : index
    %c0_18 = arith.constant 0 : index
    %44 = vector.load %arg2[%c9, %c0_18] : memref<10x8xf32, #tpu.memory_space<vmem>>, vector<1x8xf32>
    %c9_19 = arith.constant 9 : index
    %45 = memref.load %arg1[%c9_19] : memref<11xf32, #tpu.memory_space<smem>>
    %46 = vector.broadcast %45 : f32 to vector<1x8xf32>
    %47 = arith.mulf %44, %46 : vector<1x8xf32>
    %48 = arith.addf %43, %47 : vector<1x8xf32>
    %c10 = arith.constant 10 : index
    %49 = memref.load %arg1[%c10] : memref<11xf32, #tpu.memory_space<smem>>
    %50 = vector.broadcast %49 : f32 to vector<1x8xf32>
    %51 = arith.addf %48, %50 : vector<1x8xf32>
    %c0_20 = arith.constant 0 : index
    %c0_21 = arith.constant 0 : index
    %52 = vector.load %arg3[%c0_20, %c0_21] : memref<1x8xf32, #tpu.memory_space<vmem>>, vector<1x8xf32>
    tpu.vector_store %arg3[%c0_20, %c0_21], %51 {strides = array<i32>} : memref<1x8xf32, #tpu.memory_space<vmem>>, vector<1x8xf32>,
    return
  }
  func.func @transform_0(%arg0: i32) -> i32 {
    %c0_i32 = arith.constant 0 : i32
    %c0_i32_0 = arith.constant 0 : i32
    return %c0_i32 : i32
  }
  func.func @transform_1(%arg0: i32) -> (i32, i32) {
    %c0_i32 = arith.constant 0 : i32
    %c0_i32_0 = arith.constant 0 : i32
    return %c0_i32, %arg0 : i32, i32
  }
  func.func @transform_2(%arg0: i32) -> (i32, i32) {
    %c0_i32 = arith.constant 0 : i32
    %c0_i32_0 = arith.constant 0 : i32
    return %c0_i32, %arg0 : i32, i32
  }
}

</mosaic_0001>

<bundles_post_ra>
// kernel: tpu_custom_call.1
= control target key start
LH: loop header
LB: loop body
LE: loop exit
PB: predicated region body
PF: predicated region fallthrough
CT: control target
= control target key end

     0   :  { %7 = vsyncpa [#allocation4], 0  ;;  %s206_s0 = inlined_call_operand.vmem [shape: f32[11], index: 0, kind: input, shape index: {}]   ;;  %s207_s1 = inlined_call_operand.vmem [shape: f32[10,8], index: 1, kind: input, shape index: {}]   ;;  %s208_s2 = inlined_call_operand.hbm [shape: f32[1,8], index: 2, kind: output, shape index: {}]  }
   0x1   :  { %8 = vsyncpa [#allocation3], 0  ;;  %s15_s11 = sshll.u32 %s206_s0, 4  ;;  %s16_s11 = int_to_ptr.vmem [resolvable:$true] %s15_s11 }
   0x2   :  { %s106_s12 = scalar_lea.vmem %s16_s11, 16  ;;  %p111_p1 = scmp.lt.s32.totalorder %s16_s11, %s16_s11 }
   0x3   :  { %p107_p0 = scmp.ne.s32.totalorder %s16_s11, %s106_s12  ;;  %p112_p2 = scmp.lt.s32.totalorder %s106_s12, %s106_s12 }
   0x5   :  { %p113_p3 = por %p112_p2, %p111_p1 }
   0x7   :  { %p114_p4 = pnand %p113_p3, %p107_p0 }
   0x9   :  { %117 = shalt.err (!%p114_p4)
}
   0xa   :  { %s144_s13 = smov [#allocation2]  }
   0xb   :  { %18 = dma.vmem_to_smem %s16_s11, 16, %s144_s13, [#allocation4]  }
   0xc   :  { %140 = dma.done.wait [#allocation4], 16  }
   0xd   :  { %141 = vsyncadd [#allocation4], 4294967280 }
   0xe   :  { %24 = sfence }
   0xf   :  { %s26_s14 = sld [smem:[#allocation2]]  ;;  %s94_s15 = sld [smem:[#allocation2 + $0x1]]  ;;  %v25_v0 = vld [vmem:[%s207_s1] sm:$0x1]  ;;  %v29_v1 = vld [vmem:[%s207_s1 + $0x1] sm:$0x1] }
  0x10   :  { %s95_s16 = sld [smem:[#allocation2 + $0x2]]  ;;  %s96_s17 = sld [smem:[#allocation2 + $0x3]]  ;;  %v34_v2 = vld [vmem:[%s207_s1 + $0x2] sm:$0x1]  ;;  %v39_v7 = vld [vmem:[%s207_s1 + $0x3] sm:$0x1] }
  0x11   :  { %s97_s18 = sld [smem:[#allocation2 + $0x4]]  ;;  %s98_s19 = sld [smem:[#allocation2 + $0x5]]  ;;  %v44_v11 = vld [vmem:[%s207_s1 + $0x4] sm:$0x1]  ;;  %v49_v15 = vld [vmem:[%s207_s1 + $0x5] sm:$0x1] }
  0x12   :  { %s99_s25 = sld [smem:[#allocation2 + $0x6]]  ;;  %s100_s28 = sld [smem:[#allocation2 + $0x7]]  ;;  %v54_v19 = vld [vmem:[%s207_s1 + $0x6] sm:$0x1]  ;;  %v59_v23 = vld [vmem:[%s207_s1 + $0x7] sm:$0x1] }
  0x13   :  { %s101_s3 = sld [smem:[#allocation2 + $0x8]]  ;;  %s102_s6 = sld [smem:[#allocation2 + $0x9]]  ;;  %v64_v27 = vld [vmem:[%s207_s1 + $0x8] sm:$0x1]  ;;  %v69_v31 = vld [vmem:[%s207_s1 + $0x9] sm:$0x1] }
  0x14   :  { %s103_s13 = sld [smem:[#allocation2 + $0xa]]  ;;  %vm77_vm0 = vcmask 57344  }
  0x15   :  { %v27_v3 = vstv %s26_s14  ;;  %v31_v5 = vstv %s94_s15 }
  0x16   :  { %v28_v4 = vmul.f32 %v27_v3, %v25_v0  ;;  %v36_v6 = vstv %s95_s16  ;;  %v32_v8 = vmul.f32 %v31_v5, %v29_v1  ;;  %v41_v10 = vstv %s96_s17  ;;  %s145_s16 = smov [#allocation5]  }
  0x17   :  { %v37_v9 = vmul.f32 %v36_v6, %v34_v2  ;;  %v46_v12 = vstv %s97_s18  ;;  %v42_v14 = vmul.f32 %v41_v10, %v39_v7  ;;  %v51_v16 = vstv %s98_s19  ;;  %s85_s17 = sshll.u32 %s145_s16, 4  ;;  %s86_s17 = int_to_ptr.vmem [resolvable:$true] %s85_s17 }
  0x18   :  { %v33_v13 = vadd.f32 %v32_v8, %v28_v4  ;;  %v47_v18 = vmul.f32 %v46_v12, %v44_v11  ;;  %v56_v20 = vstv %s99_s25  ;;  %v52_v22 = vmul.f32 %v51_v16, %v49_v15  ;;  %s118_s18 = scalar_lea.vmem %s86_s17, 16  ;;  %s122_s19 = scalar_lea.vmem %s86_s17, 32 }
  0x19   :  { %v61_v24 = vstv %s100_s28  ;;  %v57_v26 = vmul.f32 %v56_v20, %v54_v19  ;;  %v66_v28 = vstv %s101_s3  ;;  %v71_v32 = vstv %s102_s6  ;;  %p119_p5 = scmp.ne.s32.totalorder %s86_s17, %s118_s18  ;;  %p123_p6 = scmp.lt.s32.totalorder %s86_s17, %s86_s17 }
  0x1a   :  { %v38_v17 = vadd.f32 %v37_v9, %v33_v13  ;;  %v62_v30 = vmul.f32 %v61_v24, %v59_v23  ;;  %v67_v34 = vmul.f32 %v66_v28, %v64_v27  ;;  %v72_v36 = vmul.f32 %v71_v32, %v69_v31  ;;  %p124_p7 = scmp.lt.s32.totalorder %s122_s19, %s118_s18 }
  0x1b   :  { %v75_v38 = vstv %s103_s13 }
  0x1c   :  { %v43_v21 = vadd.f32 %v42_v14, %v38_v17  ;;  %p125_p8 = por %p124_p7, %p123_p6 }
  0x1e   :  { %v48_v25 = vadd.f32 %v47_v18, %v43_v21  ;;  %p126_p9 = pnand %p125_p8, %p119_p5 }
  0x20   :  { %v53_v29 = vadd.f32 %v52_v22, %v48_v25 }
  0x22   :  { %v58_v33 = vadd.f32 %v57_v26, %v53_v29 }
  0x24   :  { %v63_v35 = vadd.f32 %v62_v30, %v58_v33 }
  0x26   :  { %v68_v37 = vadd.f32 %v67_v34, %v63_v35 }
  0x28   :  { %v73_v39 = vadd.f32 %v72_v36, %v68_v37 }
  0x2a   :  { %v76_v40 = vadd.f32 %v75_v38, %v73_v39 }
  0x2c   :  { %78 = vst.msk [vmem:[#allocation5] sm:$0x1] %vm77_vm0, %v76_v40 }
  0x2d   :  { %129 = shalt.err (!%p126_p9)
}
  0x2e   :  { %s130_s20 = scalar_lea.hbm %s208_s2, 16 }
  0x2f   :  { %p131_p10 = scmp.ne.s32.totalorder %s208_s2, %s130_s20  ;;  %p134_p11 = scmp.lt.u32.totalorder %s130_s20, %s208_s2 }
  0x31   :  { %p136_p12 = pnand %p134_p11, %p131_p10 }
  0x33   :  { %139 = shalt.err (!%p136_p12)
}
  0x34   :  { %88 = dma.vmem_to_hbm [thread:$0]  %s86_s17, 16, %s208_s2, [#allocation3]  }
  0x35   :  { %142 = dma.done.wait [#allocation3], 16  }
  0x36   :  { %143 = vsyncadd [#allocation3], 4294967280 }
  0x37   :  { %92 = vsyncpa [#allocation3], 1 }
  0x38   :  { %93 = vsyncpa [#allocation4], 1 }

</bundles_post_ra>
